<compile_context>
chip_gen: v6e
topology: v6e:2x2x1
jax: 0.10.0
libtpu: 0.0.40
codegen_flags: <defaults>
</compile_context>

<pallas_src>
import functools

import jax
import jax.numpy as jnp
from jax.experimental import pallas as pl
from jax.experimental.pallas import tpu as pltpu

NEG_SLOPE = 0.01  # PyTorch LeakyReLU default


def _round_up(x, m):
    return ((x + m - 1) // m) * m


def _detect_bf16_epilogue():
    """bf16 LeakyReLU epilogue on v6e/v7x; f32 on v5e (no bf16 VPU)."""
    try:
        kind = jax.devices()[0].device_kind.lower()
    except Exception:  # pragma: no cover - defensive
        return True
    return "v5" not in kind


_BF16_EPILOGUE = _detect_bf16_epilogue()


def _leaky(acc_f32, bf16_epilogue):
    """LeakyReLU(0.01) on an f32 MXU accumulator; returns bf16 for the next MXU op."""
    if bf16_epilogue:
        h = acc_f32.astype(jnp.bfloat16)
        return jnp.maximum(h, NEG_SLOPE * h)
    return jnp.maximum(acc_f32, NEG_SLOPE * acc_f32).astype(jnp.bfloat16)


# --------------------------------------------------------------------------
# Kernels
# --------------------------------------------------------------------------
def _mlp_chain_kernel(bf16_epi, x_ref, w0, w1, w2, w3, w4, b_ref, o_ref):
    """Row chain: x(tile_n, C) bf16 -> ... -> lane-dense (1, tile_n) output row."""
    h = x_ref[...]                                            # (tile_n, C) bf16
    for w_ref in (w0, w1, w2, w3):                            # (in_i, out_i) bf16
        acc = jnp.dot(h, w_ref[...], preferred_element_type=jnp.float32)
        h = _leaky(acc, bf16_epi)
    # Final 32 -> 1 layer, emitted lane-dense: w4 is (1, 32); contract the last
    # dims of (1, 32) and (tile_n, 32) -> (1, tile_n)  (w_last @ h^T on the MXU).
    out = jax.lax.dot_general(
        w4[...], h, (((1,), (1,)), ((), ())),
        preferred_element_type=jnp.float32)                   # (1, tile_n) f32
    o_ref[0] = out + b_ref[0, 0]                              # bias from SMEM


def _ctr_chain_2d(bf16_epi, h, w_refs, w_last_ref, bias):
    """Conv1d(k=1) chain on a (C, lanes) bf16 tile; returns (1, lanes) f32."""
    for w_ref in w_refs:                                      # (out_i, in_i) bf16
        acc = jnp.dot(w_ref[...], h, preferred_element_type=jnp.float32)
        h = _leaky(acc, bf16_epi)
    out = jnp.dot(w_last_ref[...], h, preferred_element_type=jnp.float32)
    return out + bias


def _ctr_collapsed_kernel(bf16_epi, x_ref, w0, w1, w2, w3, b_ref, o_ref):
    """Whole batch collapsed into lanes: x is (C, B*L)."""
    o_ref[...] = _ctr_chain_2d(bf16_epi, x_ref[...], (w0, w1, w2), w3,
                               b_ref[0, 0])


def _ctr_tiled_kernel(bf16_epi, x_ref, w0, w1, w2, w3, b_ref, o_ref):
    """Per-(batch, L-tile) chain: x block is (1, C, tile_l)."""
    o_ref[0] = _ctr_chain_2d(bf16_epi, x_ref[0], (w0, w1, w2), w3, b_ref[0, 0])


# --------------------------------------------------------------------------
# Tile selection
# --------------------------------------------------------------------------
def _choose_tiles(n, max_tile, *, granule=8, min_split=1024, want_tiles=2):
    """Big tiles (amortize the ~0.35us/step cost) but keep >= `want_tiles` grid
    steps once there is enough work, so v7x can shard the 'parallel' axis over
    its two TensorCores."""
    if n <= min_split:
        return n, 1                       # one full-extent block, no padding
    num = max(want_tiles, pl.cdiv(n, max_tile))
    tile = _round_up(pl.cdiv(n, num), granule)
    num = pl.cdiv(n, tile)
    return tile, num


# --------------------------------------------------------------------------
# Wrappers
# --------------------------------------------------------------------------
def run_mlp(x, w_rows, w_last, bias, *, max_tile_n=2048, bf16_epilogue=None):
    """x: (N, C); w_rows: 4x (in,out) bf16; w_last: (1,32) bf16; bias: (1,1) f32.

    Returns (N, 1) f32.  Output is produced lane-dense as (num_tiles, 1, tile_n)
    and reshaped on the host side (tiny)."""
    if bf16_epilogue is None:
        bf16_epilogue = _BF16_EPILOGUE
    n, c = x.shape
    tile_n, num_tiles = _choose_tiles(n, max_tile_n)

    # bf16 input halves the dominant HBM->VMEM traffic; fuses upstream under jit.
    x = x.astype(jnp.bfloat16)

    layer_macs = sum(int(w.shape[0]) * int(w.shape[1]) for w in (*w_rows, w_last))
    wbytes = sum(int(w.size) * 2 for w in (*w_rows, w_last)) + int(bias.size) * 4
    cost = pl.CostEstimate(flops=2 * n * layer_macs, transcendentals=0,
                           bytes_accessed=n * c * 2 + n * 4 + wbytes)

    in_specs = [pl.BlockSpec((tile_n, c), lambda i: (i, 0))]
    in_specs += [pl.BlockSpec(w.shape, lambda i: (0, 0)) for w in w_rows]
    in_specs += [pl.BlockSpec(w_last.shape, lambda i: (0, 0)),
                 pl.BlockSpec(memory_space=pltpu.MemorySpace.SMEM)]

    out = pl.pallas_call(
        functools.partial(_mlp_chain_kernel, bf16_epilogue),
        out_shape=jax.ShapeDtypeStruct((num_tiles, 1, tile_n), jnp.float32),
        grid_spec=pltpu.PrefetchScalarGridSpec(
            num_scalar_prefetch=0,
            grid=(num_tiles,),
            in_specs=in_specs,
            out_specs=pl.BlockSpec((1, 1, tile_n), lambda i: (i, 0, 0)),
        ),
        compiler_params=pltpu.CompilerParams(
            dimension_semantics=("parallel",)),
        cost_estimate=cost,
    )(x, *w_rows, w_last, bias)
    return out.reshape(num_tiles * tile_n, 1)[:n]


def run_ctr(enc, w_cols, w_last, bias, *, max_tile_l=2048, bf16_epilogue=None):
    """enc: (B, C, L); w_cols: 3x (out,in) bf16; w_last: (1,32) bf16.

    Returns (B, 1, L) f32."""
    if bf16_epilogue is None:
        bf16_epilogue = _BF16_EPILOGUE
    b, c, l = enc.shape
    m = b * l

    layer_macs = sum(int(w.shape[0]) * int(w.shape[1]) for w in (*w_cols, w_last))
    wbytes = sum(int(w.size) * 2 for w in (*w_cols, w_last)) + int(bias.size) * 4
    cost = pl.CostEstimate(flops=2 * m * layer_macs, transcendentals=0,
                           bytes_accessed=m * c * 2 + m * 4 + wbytes)

    if m <= max_tile_l:
        # Collapse batch into the lane dim: (B, C, L) -> (C, B*L).  One grid
        # step and one lane-dense (1, B*L) writeback instead of B masked
        # (1, L) stores; raises MXU lane utilization when L < 128.
        x2d = jnp.transpose(enc.astype(jnp.bfloat16), (1, 0, 2)).reshape(c, m)

        in_specs = [pl.BlockSpec((c, m), lambda i: (0, 0))]
        in_specs += [pl.BlockSpec(w.shape, lambda i: (0, 0)) for w in w_cols]
        in_specs += [pl.BlockSpec(w_last.shape, lambda i: (0, 0)),
                     pl.BlockSpec(memory_space=pltpu.MemorySpace.SMEM)]

        out = pl.pallas_call(
            functools.partial(_ctr_collapsed_kernel, bf16_epilogue),
            out_shape=jax.ShapeDtypeStruct((1, m), jnp.float32),
            grid_spec=pltpu.PrefetchScalarGridSpec(
                num_scalar_prefetch=0,
                grid=(1,),
                in_specs=in_specs,
                out_specs=pl.BlockSpec((1, m), lambda i: (0, 0)),
            ),
            compiler_params=pltpu.CompilerParams(
                dimension_semantics=("arbitrary",)),
            cost_estimate=cost,
        )(x2d, *w_cols, w_last, bias)
        return jnp.transpose(out.reshape(1, b, l), (1, 0, 2))

    # Large-L path: keep (B, C, L) layout, tile L with 128-multiples (lane-dense).
    if l <= max_tile_l:
        tile_l, num_l = l, 1
    else:
        tile_l = max_tile_l                    # multiple of 128; ragged tail
        num_l = pl.cdiv(l, tile_l)             # handled by Pallas masked edge

    x = enc.astype(jnp.bfloat16)
    in_specs = [pl.BlockSpec((1, c, tile_l), lambda bi, li: (bi, 0, li))]
    in_specs += [pl.BlockSpec(w.shape, lambda bi, li: (0, 0)) for w in w_cols]
    in_specs += [pl.BlockSpec(w_last.shape, lambda bi, li: (0, 0)),
                 pl.BlockSpec(memory_space=pltpu.MemorySpace.SMEM)]

    return pl.pallas_call(
        functools.partial(_ctr_tiled_kernel, bf16_epilogue),
        out_shape=jax.ShapeDtypeStruct((b, 1, l), jnp.float32),
        grid_spec=pltpu.PrefetchScalarGridSpec(
            num_scalar_prefetch=0,
            grid=(b, num_l),
            in_specs=in_specs,
            out_specs=pl.BlockSpec((1, 1, tile_l), lambda bi, li: (bi, 0, li)),
        ),
        compiler_params=pltpu.CompilerParams(
            dimension_semantics=("parallel", "parallel")),
        cost_estimate=cost,
    )(x, *w_cols, w_last, bias)


# --------------------------------------------------------------------------
# Parameter handling (PyTorch (out, in) orientation; bf16 prepped once)
# --------------------------------------------------------------------------
def init_params(key, num_features):
    keys = jax.random.split(key, 12)
    ki = iter(keys)

    def lin(k, fan_out, fan_in):
        bound = float(fan_in) ** -0.5
        return jax.random.uniform(k, (fan_out, fan_in), jnp.float32, -bound, bound)

    # mlp: num_features -> 256 -> 128 -> 64 -> 32 -> 1 (last has bias)
    mlp_dims = [num_features, 256, 128, 64, 32, 1]
    mlp_w = [lin(next(ki), mlp_dims[i + 1], mlp_dims[i]) for i in range(5)]
    mlp_b = jax.random.uniform(next(ki), (1, 1), jnp.float32,
                               -(32.0 ** -0.5), 32.0 ** -0.5)

    # ctr_mlp (Conv1d k=1, kernel dim squeezed): 256 -> 128 -> 64 -> 32 -> 1
    ctr_dims = [256, 128, 64, 32, 1]
    ctr_w = [lin(next(ki), ctr_dims[i + 1], ctr_dims[i]) for i in range(4)]
    ctr_b = jax.random.uniform(next(ki), (1, 1), jnp.float32,
                               -(32.0 ** -0.5), 32.0 ** -0.5)
    return (mlp_w, mlp_b), (ctr_w, ctr_b)


def prepare_params(params):
    """One-time prep: transpose + bf16 cast hoisted out of the forward."""
    (mlp_w, mlp_b), (ctr_w, ctr_b) = params
    return {
        # Row-major chain: hidden layers as (in, out); last layer kept (1, 32).
        "mlp_rows": tuple(w.T.astype(jnp.bfloat16) for w in mlp_w[:-1]),
        "mlp_last": mlp_w[-1].astype(jnp.bfloat16),
        "mlp_b": mlp_b,
        # Column-major chain: PyTorch (out, in) orientation used as-is.
        "ctr_cols": tuple(w.astype(jnp.bfloat16) for w in ctr_w[:-1]),
        "ctr_last": ctr_w[-1].astype(jnp.bfloat16),
        "ctr_b": ctr_b,
    }


# --------------------------------------------------------------------------
# Forward (mirrors Discriminator.forward)
# --------------------------------------------------------------------------
@jax.jit
def _forward_core(centers_features, enc, domain, prepped):
    domain_preds = run_mlp(centers_features, prepped["mlp_rows"],
                           prepped["mlp_last"], prepped["mlp_b"])      # (N, 1)
    domain_ctr_preds = run_ctr(enc, prepped["ctr_cols"],
                               prepped["ctr_last"], prepped["ctr_b"])  # (B, 1, L)
    domain_refs = jnp.full(domain_preds.shape, domain, domain_preds.dtype)
    domain_ctr_refs = jnp.full(domain_ctr_preds.shape, domain,
                               domain_ctr_preds.dtype)
    return {"domain_preds": domain_preds,
            "domain_refs": domain_refs,
            "domain_ctr_preds": domain_ctr_preds,
            "domain_ctr_refs": domain_ctr_refs}


def discriminator_forward(batch_dict, prepped_params, *, print_points=False):
    # GradientReversal = identity in the forward pass.
    ret_dict = _forward_core(batch_dict["centers_features"],
                             batch_dict["encoder_features"][3],
                             jnp.asarray(batch_dict["domain"], jnp.float32),
                             prepped_params)
    # Mirrors the module's print(batch_dict['points_features']); off by default
    # so jitted/benchmarked callers don't pay the device->host sync.
    if print_points:
        print(batch_dict["points_features"])
    return batch_dict, ret_dict


# --------------------------------------------------------------------------
# Pure-JAX references mirroring the kernel numerics (bf16 MXU, f32 accum)
# --------------------------------------------------------------------------
def reference_mlp(x, mlp_w, bias, bf16_epilogue):
    h = x.astype(jnp.bfloat16)
    for w in mlp_w[:-1]:
        acc = jnp.dot(h, w.T.astype(jnp.bfloat16),
                      preferred_element_type=jnp.float32)
        h = _leaky(acc, bf16_epilogue)
    out = jnp.dot(h, mlp_w[-1].T.astype(jnp.bfloat16),
                  preferred_element_type=jnp.float32)
    return out + bias[0, 0]


def reference_ctr(enc, ctr_w, bias, bf16_epilogue):
    h = enc.astype(jnp.bfloat16)
    for w in ctr_w[:-1]:
        acc = jnp.einsum("oc,bcl->bol", w.astype(jnp.bfloat16), h,
                         preferred_element_type=jnp.float32)
        h = _leaky(acc, bf16_epilogue)
    out = jnp.einsum("oc,bcl->bol", ctr_w[-1].astype(jnp.bfloat16), h,
                     preferred_element_type=jnp.float32)
    return out + bias[0, 0]


if __name__ == "__main__":
    key = jax.random.PRNGKey(0)
    k_in, k_enc, k_pts, k_par = jax.random.split(key, 4)

    num_features = 128
    N = 16          # number of center points
    B, L = 2, 8     # encoder feature batch / length

    centers_features = jax.random.normal(k_in, (N, num_features), jnp.float32)
    encoder_features = [None, None, None,
                        jax.random.normal(k_enc, (B, 256, L), jnp.float32)]
    points_features = jax.random.normal(k_pts, (N, 4), jnp.float32)

    batch_dict = {
        "centers_features": centers_features,
        "encoder_features": encoder_features,
        "points_features": points_features,
        "domain": 1.0,
    }

    params = init_params(k_par, num_features)
    prepped = prepare_params(params)

    _, ret_dict = discriminator_forward(batch_dict, prepped)
    jax.block_until_ready(ret_dict)

    # Correctness check against pure-JAX references with matching numerics.
    (mlp_w, mlp_b), (ctr_w, ctr_b) = params
    ref_preds = reference_mlp(centers_features, mlp_w, mlp_b, _BF16_EPILOGUE)
    ref_ctr = reference_ctr(encoder_features[3], ctr_w, ctr_b, _BF16_EPILOGUE)

    assert ret_dict["domain_preds"].shape == (N, 1)
    assert ret_dict["domain_ctr_preds"].shape == (B, 1, L)
    assert jnp.allclose(ret_dict["domain_preds"], ref_preds,
                        atol=5e-3, rtol=5e-3)
    assert jnp.allclose(ret_dict["domain_ctr_preds"], ref_ctr,
                        atol=5e-3, rtol=5e-3)
    assert jnp.allclose(ret_dict["domain_refs"], 1.0)
    assert jnp.allclose(ret_dict["domain_ctr_refs"], 1.0)

    print("KERNEL_OK")
</pallas_src>

<mosaic_0001>
module attributes {stable_mosaic.version = 11 : i64} {
  func.func @_ctr_collapsed_kernel(%arg0: i32, %arg1: memref<256x16xbf16, #tpu.memory_space<vmem>>, %arg2: memref<128x256xbf16, #tpu.memory_space<vmem>>, %arg3: memref<64x128xbf16, #tpu.memory_space<vmem>>, %arg4: memref<32x64xbf16, #tpu.memory_space<vmem>>, %arg5: memref<1x32xbf16, #tpu.memory_space<vmem>>, %arg6: memref<1x1xf32, #tpu.memory_space<smem>>, %arg7: memref<1x16xf32, #tpu.memory_space<vmem>>) attributes {dimension_semantics = [#tpu.dimension_semantics<arbitrary>], iteration_bounds = array<i64: 1>, scalar_prefetch = 0 : i64, scratch_operands = 0 : i64, tpu.core_type = #tpu.core_type<tc>, window_params = [{pipeline_mode = #tpu.pipeline_mode<synchronous>, transform_indices = @transform_0, window_bounds = array<i64: 256, 16>}, {pipeline_mode = #tpu.pipeline_mode<synchronous>, transform_indices = @transform_1, window_bounds = array<i64: 128, 256>}, {pipeline_mode = #tpu.pipeline_mode<synchronous>, transform_indices = @transform_2, window_bounds = array<i64: 64, 128>}, {pipeline_mode = #tpu.pipeline_mode<synchronous>, transform_indices = @transform_3, window_bounds = array<i64: 32, 64>}, {pipeline_mode = #tpu.pipeline_mode<synchronous>, transform_indices = @transform_4, window_bounds = array<i64: 1, 32>}, {transform_indices = @transform_5, window_bounds = array<i64: 1, 1>}, {pipeline_mode = #tpu.pipeline_mode<synchronous>, transform_indices = @transform_6, window_bounds = array<i64: 1, 16>}]} {
    %c0 = arith.constant 0 : index
    %c0_0 = arith.constant 0 : index
    %0 = vector.load %arg1[%c0, %c0_0] : memref<256x16xbf16, #tpu.memory_space<vmem>>, vector<256x16xbf16>
    %c0_1 = arith.constant 0 : index
    %c0_2 = arith.constant 0 : index
    %1 = memref.load %arg6[%c0_1, %c0_2] : memref<1x1xf32, #tpu.memory_space<smem>>
    %c0_3 = arith.constant 0 : index
    %c0_4 = arith.constant 0 : index
    %2 = vector.load %arg2[%c0_3, %c0_4] : memref<128x256xbf16, #tpu.memory_space<vmem>>, vector<128x256xbf16>
    %cst = arith.constant dense<0.000000e+00> : vector<128x16xf32>
    %3 = tpu.matmul %2, %0, %cst {dimension_numbers = #tpu.dot_dimension_numbers<[1], [0], [0], [1], [0, 0, 1, 1], [], []>} : vector<128x256xbf16>, vector<256x16xbf16>, vector<128x16xf32> -> vector<128x16xf32>
    %4 = arith.truncf %3 : vector<128x16xf32> to vector<128x16xbf16>
    %cst_5 = arith.constant 1.000980e-02 : bf16
    %5 = vector.broadcast %cst_5 : bf16 to vector<128x16xbf16>
    %6 = arith.mulf %5, %4 : vector<128x16xbf16>
    %7 = arith.maximumf %4, %6 : vector<128x16xbf16>
    %c0_6 = arith.constant 0 : index
    %c0_7 = arith.constant 0 : index
    %8 = vector.load %arg3[%c0_6, %c0_7] : memref<64x128xbf16, #tpu.memory_space<vmem>>, vector<64x128xbf16>
    %cst_8 = arith.constant dense<0.000000e+00> : vector<64x16xf32>
    %9 = tpu.matmul %8, %7, %cst_8 {dimension_numbers = #tpu.dot_dimension_numbers<[1], [0], [0], [1], [0, 0, 1, 1], [], []>} : vector<64x128xbf16>, vector<128x16xbf16>, vector<64x16xf32> -> vector<64x16xf32>
    %10 = arith.truncf %9 : vector<64x16xf32> to vector<64x16xbf16>
    %cst_9 = arith.constant 1.000980e-02 : bf16
    %11 = vector.broadcast %cst_9 : bf16 to vector<64x16xbf16>
    %12 = arith.mulf %11, %10 : vector<64x16xbf16>
    %13 = arith.maximumf %10, %12 : vector<64x16xbf16>
    %c0_10 = arith.constant 0 : index
    %c0_11 = arith.constant 0 : index
    %14 = vector.load %arg4[%c0_10, %c0_11] : memref<32x64xbf16, #tpu.memory_space<vmem>>, vector<32x64xbf16>
    %cst_12 = arith.constant dense<0.000000e+00> : vector<32x16xf32>
    %15 = tpu.matmul %14, %13, %cst_12 {dimension_numbers = #tpu.dot_dimension_numbers<[1], [0], [0], [1], [0, 0, 1, 1], [], []>} : vector<32x64xbf16>, vector<64x16xbf16>, vector<32x16xf32> -> vector<32x16xf32>
    %16 = arith.truncf %15 : vector<32x16xf32> to vector<32x16xbf16>
    %cst_13 = arith.constant 1.000980e-02 : bf16
    %17 = vector.broadcast %cst_13 : bf16 to vector<32x16xbf16>
    %18 = arith.mulf %17, %16 : vector<32x16xbf16>
    %19 = arith.maximumf %16, %18 : vector<32x16xbf16>
    %c0_14 = arith.constant 0 : index
    %c0_15 = arith.constant 0 : index
    %20 = vector.load %arg5[%c0_14, %c0_15] : memref<1x32xbf16, #tpu.memory_space<vmem>>, vector<1x32xbf16>
    %cst_16 = arith.constant dense<0.000000e+00> : vector<1x16xf32>
    %21 = tpu.matmul %20, %19, %cst_16 {dimension_numbers = #tpu.dot_dimension_numbers<[1], [0], [0], [1], [0, 0, 1, 1], [], []>} : vector<1x32xbf16>, vector<32x16xbf16>, vector<1x16xf32> -> vector<1x16xf32>
    %22 = vector.broadcast %1 : f32 to vector<1x16xf32>
    %23 = arith.addf %21, %22 : vector<1x16xf32>
    %c0_17 = arith.constant 0 : index
    %c0_18 = arith.constant 0 : index
    %24 = vector.load %arg7[%c0_17, %c0_18] : memref<1x16xf32, #tpu.memory_space<vmem>>, vector<1x16xf32>
    tpu.vector_store %arg7[%c0_17, %c0_18], %23 {strides = array<i32>} : memref<1x16xf32, #tpu.memory_space<vmem>>, vector<1x16xf32>,
    return
  }
  func.func @transform_0(%arg0: i32) -> (i32, i32) {
    %c0_i32 = arith.constant 0 : i32
    %c0_i32_0 = arith.constant 0 : i32
    %c0_i32_1 = arith.constant 0 : i32
    return %c0_i32, %c0_i32_0 : i32, i32
  }
  func.func @transform_1(%arg0: i32) -> (i32, i32) {
    %c0_i32 = arith.constant 0 : i32
    %c0_i32_0 = arith.constant 0 : i32
    %c0_i32_1 = arith.constant 0 : i32
    return %c0_i32, %c0_i32_0 : i32, i32
  }
  func.func @transform_2(%arg0: i32) -> (i32, i32) {
    %c0_i32 = arith.constant 0 : i32
    %c0_i32_0 = arith.constant 0 : i32
    %c0_i32_1 = arith.constant 0 : i32
    return %c0_i32, %c0_i32_0 : i32, i32
  }
  func.func @transform_3(%arg0: i32) -> (i32, i32) {
    %c0_i32 = arith.constant 0 : i32
    %c0_i32_0 = arith.constant 0 : i32
    %c0_i32_1 = arith.constant 0 : i32
    return %c0_i32, %c0_i32_0 : i32, i32
  }
  func.func @transform_4(%arg0: i32) -> (i32, i32) {
    %c0_i32 = arith.constant 0 : i32
    %c0_i32_0 = arith.constant 0 : i32
    %c0_i32_1 = arith.constant 0 : i32
    return %c0_i32, %c0_i32_0 : i32, i32
  }
  func.func @transform_5(%arg0: i32) -> (i32, i32) {
    %c0_i32 = arith.constant 0 : i32
    %c0_i32_0 = arith.constant 0 : i32
    %c0_i32_1 = arith.constant 0 : i32
    return %c0_i32, %c0_i32_0 : i32, i32
  }
  func.func @transform_6(%arg0: i32) -> (i32, i32) {
    %c0_i32 = arith.constant 0 : i32
    %c0_i32_0 = arith.constant 0 : i32
    %c0_i32_1 = arith.constant 0 : i32
    return %c0_i32, %c0_i32_0 : i32, i32
  }
}

module attributes {stable_mosaic.version = 11 : i64} {
  func.func @_mlp_chain_kernel(%arg0: i32, %arg1: memref<16x128xbf16, #tpu.memory_space<vmem>>, %arg2: memref<128x256xbf16, #tpu.memory_space<vmem>>, %arg3: memref<256x128xbf16, #tpu.memory_space<vmem>>, %arg4: memref<128x64xbf16, #tpu.memory_space<vmem>>, %arg5: memref<64x32xbf16, #tpu.memory_space<vmem>>, %arg6: memref<1x32xbf16, #tpu.memory_space<vmem>>, %arg7: memref<1x1xf32, #tpu.memory_space<smem>>, %arg8: memref<1x1x16xf32, #tpu.memory_space<vmem>>) attributes {dimension_semantics = [#tpu.dimension_semantics<parallel>], iteration_bounds = array<i64: 1>, scalar_prefetch = 0 : i64, scratch_operands = 0 : i64, tpu.core_type = #tpu.core_type<tc>, window_params = [{transform_indices = @transform_0, window_bounds = array<i64: 16, 128>}, {pipeline_mode = #tpu.pipeline_mode<synchronous>, transform_indices = @transform_1, window_bounds = array<i64: 128, 256>}, {pipeline_mode = #tpu.pipeline_mode<synchronous>, transform_indices = @transform_2, window_bounds = array<i64: 256, 128>}, {pipeline_mode = #tpu.pipeline_mode<synchronous>, transform_indices = @transform_3, window_bounds = array<i64: 128, 64>}, {pipeline_mode = #tpu.pipeline_mode<synchronous>, transform_indices = @transform_4, window_bounds = array<i64: 64, 32>}, {pipeline_mode = #tpu.pipeline_mode<synchronous>, transform_indices = @transform_5, window_bounds = array<i64: 1, 32>}, {transform_indices = @transform_6, window_bounds = array<i64: 1, 1>}, {transform_indices = @transform_7, window_bounds = array<i64: 1, 1, 16>}]} {
    %c0 = arith.constant 0 : index
    %c0_0 = arith.constant 0 : index
    %0 = vector.load %arg1[%c0, %c0_0] : memref<16x128xbf16, #tpu.memory_space<vmem>>, vector<16x128xbf16>
    %c0_1 = arith.constant 0 : index
    %c0_2 = arith.constant 0 : index
    %1 = vector.load %arg2[%c0_1, %c0_2] : memref<128x256xbf16, #tpu.memory_space<vmem>>, vector<128x256xbf16>
    %cst = arith.constant dense<0.000000e+00> : vector<16x256xf32>
    %2 = tpu.matmul %0, %1, %cst {dimension_numbers = #tpu.dot_dimension_numbers<[1], [0], [0], [1], [0, 0, 1, 1], [], []>} : vector<16x128xbf16>, vector<128x256xbf16>, vector<16x256xf32> -> vector<16x256xf32>
    %3 = arith.truncf %2 : vector<16x256xf32> to vector<16x256xbf16>
    %cst_3 = arith.constant 1.000980e-02 : bf16
    %4 = vector.broadcast %cst_3 : bf16 to vector<16x256xbf16>
    %5 = arith.mulf %4, %3 : vector<16x256xbf16>
    %6 = arith.maximumf %3, %5 : vector<16x256xbf16>
    %c0_4 = arith.constant 0 : index
    %c0_5 = arith.constant 0 : index
    %7 = vector.load %arg3[%c0_4, %c0_5] : memref<256x128xbf16, #tpu.memory_space<vmem>>, vector<256x128xbf16>
    %cst_6 = arith.constant dense<0.000000e+00> : vector<16x128xf32>
    %8 = tpu.matmul %6, %7, %cst_6 {dimension_numbers = #tpu.dot_dimension_numbers<[1], [0], [0], [1], [0, 0, 1, 1], [], []>} : vector<16x256xbf16>, vector<256x128xbf16>, vector<16x128xf32> -> vector<16x128xf32>
    %9 = arith.truncf %8 : vector<16x128xf32> to vector<16x128xbf16>
    %cst_7 = arith.constant 1.000980e-02 : bf16
    %10 = vector.broadcast %cst_7 : bf16 to vector<16x128xbf16>
    %11 = arith.mulf %10, %9 : vector<16x128xbf16>
    %12 = arith.maximumf %9, %11 : vector<16x128xbf16>
    %c0_8 = arith.constant 0 : index
    %c0_9 = arith.constant 0 : index
    %13 = vector.load %arg4[%c0_8, %c0_9] : memref<128x64xbf16, #tpu.memory_space<vmem>>, vector<128x64xbf16>
    %cst_10 = arith.constant dense<0.000000e+00> : vector<16x64xf32>
    %14 = tpu.matmul %12, %13, %cst_10 {dimension_numbers = #tpu.dot_dimension_numbers<[1], [0], [0], [1], [0, 0, 1, 1], [], []>} : vector<16x128xbf16>, vector<128x64xbf16>, vector<16x64xf32> -> vector<16x64xf32>
    %15 = arith.truncf %14 : vector<16x64xf32> to vector<16x64xbf16>
    %cst_11 = arith.constant 1.000980e-02 : bf16
    %16 = vector.broadcast %cst_11 : bf16 to vector<16x64xbf16>
    %17 = arith.mulf %16, %15 : vector<16x64xbf16>
    %18 = arith.maximumf %15, %17 : vector<16x64xbf16>
    %c0_12 = arith.constant 0 : index
    %c0_13 = arith.constant 0 : index
    %19 = vector.load %arg5[%c0_12, %c0_13] : memref<64x32xbf16, #tpu.memory_space<vmem>>, vector<64x32xbf16>
    %cst_14 = arith.constant dense<0.000000e+00> : vector<16x32xf32>
    %20 = tpu.matmul %18, %19, %cst_14 {dimension_numbers = #tpu.dot_dimension_numbers<[1], [0], [0], [1], [0, 0, 1, 1], [], []>} : vector<16x64xbf16>, vector<64x32xbf16>, vector<16x32xf32> -> vector<16x32xf32>
    %21 = arith.truncf %20 : vector<16x32xf32> to vector<16x32xbf16>
    %cst_15 = arith.constant 1.000980e-02 : bf16
    %22 = vector.broadcast %cst_15 : bf16 to vector<16x32xbf16>
    %23 = arith.mulf %22, %21 : vector<16x32xbf16>
    %24 = arith.maximumf %21, %23 : vector<16x32xbf16>
    %c0_16 = arith.constant 0 : index
    %c0_17 = arith.constant 0 : index
    %25 = vector.load %arg6[%c0_16, %c0_17] : memref<1x32xbf16, #tpu.memory_space<vmem>>, vector<1x32xbf16>
    %cst_18 = arith.constant dense<0.000000e+00> : vector<1x16xf32>
    %26 = tpu.matmul %25, %24, %cst_18 {dimension_numbers = #tpu.dot_dimension_numbers<[1], [1], [0], [0], [0, 0, 1, 0], [], []>} : vector<1x32xbf16>, vector<16x32xbf16>, vector<1x16xf32> -> vector<1x16xf32>
    %c0_19 = arith.constant 0 : index
    %c0_20 = arith.constant 0 : index
    %27 = memref.load %arg7[%c0_19, %c0_20] : memref<1x1xf32, #tpu.memory_space<smem>>
    %28 = vector.broadcast %27 : f32 to vector<1x16xf32>
    %29 = arith.addf %26, %28 : vector<1x16xf32>
    %c0_21 = arith.constant 0 : index
    %c0_22 = arith.constant 0 : index
    %c0_23 = arith.constant 0 : index
    %30 = vector.load %arg8[%c0_21, %c0_22, %c0_23] : memref<1x1x16xf32, #tpu.memory_space<vmem>>, vector<1x1x16xf32>
    %31 = vector.shape_cast %30 : vector<1x1x16xf32> to vector<1x16xf32>
    %32 = vector.shape_cast %29 : vector<1x16xf32> to vector<1x1x16xf32>
    tpu.vector_store %arg8[%c0_21, %c0_22, %c0_23], %32 {strides = array<i32>} : memref<1x1x16xf32, #tpu.memory_space<vmem>>, vector<1x1x16xf32>,
    return
  }
  func.func @transform_0(%arg0: i32) -> (i32, i32) {
    %c0_i32 = arith.constant 0 : i32
    %c0_i32_0 = arith.constant 0 : i32
    return %arg0, %c0_i32 : i32, i32
  }
  func.func @transform_1(%arg0: i32) -> (i32, i32) {
    %c0_i32 = arith.constant 0 : i32
    %c0_i32_0 = arith.constant 0 : i32
    %c0_i32_1 = arith.constant 0 : i32
    return %c0_i32, %c0_i32_0 : i32, i32
  }
  func.func @transform_2(%arg0: i32) -> (i32, i32) {
    %c0_i32 = arith.constant 0 : i32
    %c0_i32_0 = arith.constant 0 : i32
    %c0_i32_1 = arith.constant 0 : i32
    return %c0_i32, %c0_i32_0 : i32, i32
  }
  func.func @transform_3(%arg0: i32) -> (i32, i32) {
    %c0_i32 = arith.constant 0 : i32
    %c0_i32_0 = arith.constant 0 : i32
    %c0_i32_1 = arith.constant 0 : i32
    return %c0_i32, %c0_i32_0 : i32, i32
  }
  func.func @transform_4(%arg0: i32) -> (i32, i32) {
    %c0_i32 = arith.constant 0 : i32
    %c0_i32_0 = arith.constant 0 : i32
    %c0_i32_1 = arith.constant 0 : i32
    return %c0_i32, %c0_i32_0 : i32, i32
  }
  func.func @transform_5(%arg0: i32) -> (i32, i32) {
    %c0_i32 = arith.constant 0 : i32
    %c0_i32_0 = arith.constant 0 : i32
    %c0_i32_1 = arith.constant 0 : i32
    return %c0_i32, %c0_i32_0 : i32, i32
  }
  func.func @transform_6(%arg0: i32) -> (i32, i32) {
    %c0_i32 = arith.constant 0 : i32
    %c0_i32_0 = arith.constant 0 : i32
    %c0_i32_1 = arith.constant 0 : i32
    return %c0_i32, %c0_i32_0 : i32, i32
  }
  func.func @transform_7(%arg0: i32) -> (i32, i32, i32) {
    %c0_i32 = arith.constant 0 : i32
    %c0_i32_0 = arith.constant 0 : i32
    %c0_i32_1 = arith.constant 0 : i32
    return %arg0, %c0_i32, %c0_i32_0 : i32, i32, i32
  }
}

</mosaic_0001>

<bundles_post_ra>
// kernel: _forward_core.2
= control target key start
LH: loop header
LB: loop body
LE: loop exit
PB: predicated region body
PF: predicated region fallthrough
CT: control target
= control target key end

     0   :  { %v811_v2 = vmov 0   ;;  %s1018_s0 = inlined_call_operand.vmem [shape: bf16[16,128], index: 0, kind: input, shape index: {}]   ;;  %s1019_s1 = inlined_call_operand.vmem [shape: bf16[128,256], index: 1, kind: input, shape index: {}]   ;;  %s1020_s2 = inlined_call_operand.vmem [shape: bf16[256,128], index: 2, kind: input, shape index: {}]   ;;  %s1021_s3 = inlined_call_operand.vmem [shape: bf16[128,64], index: 3, kind: input, shape index: {}]   ;;  %s1022_s4 = inlined_call_operand.vmem [shape: bf16[64,32], index: 4, kind: input, shape index: {}]   ;;  %s1023_s5 = inlined_call_operand.vmem [shape: bf16[1,32], index: 5, kind: input, shape index: {}]   ;;  %s1024_s6 = inlined_call_operand.<no memory space> [shape: f32[1,1], index: 6, kind: input, shape index: {}]   ;;  %s1025_s7 = inlined_call_operand.hbm [shape: f32[1,1,16], index: 7, kind: output, shape index: {}]  }
   0x1   :  { %v736_v0 = vld [vmem:[%s1019_s1 + $0x74] ss:$8 sps:$4 sm:$0xff]   ;;  %v738_v1 = vld [vmem:[%s1019_s1 + $0x70] ss:$8 sps:$4 sm:$0xff]   ;;  %166 = vmatprep.mubr.bf16.mxu0 %v811_v2  ;;  %v739_v3 = vld [vmem:[%s1019_s1 + $0x64] ss:$8 sps:$4 sm:$0xff]  }
   0x2   :  { %134 = vmatprep.subr.bf16.mxu0 %v736_v0  ;;  %v741_v4 = vld [vmem:[%s1019_s1 + $0x60] ss:$8 sps:$4 sm:$0xff]   ;;  %v742_v5 = vld [vmem:[%s1019_s1 + $0x54] ss:$8 sps:$4 sm:$0xff]   ;;  %v744_v6 = vld [vmem:[%s1019_s1 + $0x50] ss:$8 sps:$4 sm:$0xff]  }
   0x3   :  { %135 = vmatpush1.bf16.msra.mxu0 %v738_v1  ;;  %v745_v7 = vld [vmem:[%s1019_s1 + $0x44] ss:$8 sps:$4 sm:$0xff]   ;;  %v747_v8 = vld [vmem:[%s1019_s1 + $0x40] ss:$8 sps:$4 sm:$0xff]   ;;  %v748_v9 = vld [vmem:[%s1019_s1 + $0x34] ss:$8 sps:$4 sm:$0xff]  }
   0x4   :  { %136 = vmatprep.subr.bf16.mxu0 %v739_v3  ;;  %v761_v10 = vld [vmem:[%s1020_s2 + $0x78] sm:$0xff]   ;;  %v751_v13 = vld [vmem:[%s1019_s1 + $0x24] ss:$8 sps:$4 sm:$0xff]   ;;  %v763_v14 = vld [vmem:[%s1020_s2 + $0x70] sm:$0xff]  }
   0x5   :  { %v750_v11 = vld [vmem:[%s1019_s1 + $0x30] ss:$8 sps:$4 sm:$0xff]   ;;  %656 = vmatprep.subr.bf16.mxu1 %v761_v10  ;;  %v765_v16 = vld [vmem:[%s1020_s2 + $0x68] sm:$0xff]   ;;  %v754_v18 = vld [vmem:[%s1019_s1 + $0x14] ss:$8 sps:$4 sm:$0xff]  }
   0x6   :  { %v762_v12 = vld [vmem:[%s1020_s2 + $0x38] sm:$0xff]   ;;  %v764_v15 = vld [vmem:[%s1020_s2 + $0x30] sm:$0xff]   ;;  %v753_v17 = vld [vmem:[%s1019_s1 + $0x20] ss:$8 sps:$4 sm:$0xff]  }
   0x7   :  { %137 = vmatpush1.bf16.msra.mxu0 %v741_v4  ;;  %657 = vmatpush3.bf16.msra.mxu1 %v762_v12  ;;  %v766_v19 = vld [vmem:[%s1020_s2 + $0x28] sm:$0xff]   ;;  %v767_v20 = vld [vmem:[%s1020_s2 + $0x60] sm:$0xff]   ;;  %v756_v21 = vld [vmem:[%s1019_s1 + $0x10] ss:$8 sps:$4 sm:$0xff]  }
   0x8   :  { %138 = vmatprep.subr.bf16.mxu0 %v742_v5  ;;  %658 = vmatprep.subr.bf16.mxu1 %v763_v14  ;;  %v768_v22 = vld [vmem:[%s1020_s2 + $0x20] sm:$0xff]   ;;  %v769_v24 = vld [vmem:[%s1020_s2 + $0x58] sm:$0xff]  }
   0x9   :  { %v757_v23 = vld [vmem:[%s1019_s1 + $0x4] ss:$8 sps:$4 sm:$0xff]   ;;  %v759_v25 = vld [vmem:[%s1019_s1] ss:$8 sps:$4 sm:$0xff]   ;;  %v770_v26 = vld [vmem:[%s1020_s2 + $0x18] sm:$0xff]  }
   0xa   :  { %v760_v27 = vld [vmem:[%s1018_s0] sm:$0xff]  }
   0xb   :  { %139 = vmatpush1.bf16.msra.mxu0 %v744_v6  ;;  %659 = vmatpush3.bf16.msra.mxu1 %v764_v15 }
   0xc   :  { %140 = vmatprep.subr.bf16.mxu0 %v745_v7  ;;  %660 = vmatprep.subr.bf16.mxu1 %v765_v16 }
   0xf   :  { %141 = vmatpush1.bf16.msra.mxu0 %v747_v8  ;;  %661 = vmatpush3.bf16.msra.mxu1 %v766_v19 }
  0x10   :  { %142 = vmatprep.subr.bf16.mxu0 %v748_v9  ;;  %662 = vmatprep.subr.bf16.mxu1 %v767_v20 }
  0x13   :  { %143 = vmatpush1.bf16.msra.mxu0 %v750_v11  ;;  %663 = vmatpush3.bf16.msra.mxu1 %v768_v22 }
  0x14   :  { %144 = vmatprep.subr.bf16.mxu0 %v751_v13  ;;  %664 = vmatprep.subr.bf16.mxu1 %v769_v24 }
  0x17   :  { %145 = vmatpush1.bf16.msra.mxu0 %v753_v17  ;;  %665 = vmatpush3.bf16.msra.mxu1 %v770_v26 }
  0x18   :  { %146 = vmatprep.subr.bf16.mxu0 %v754_v18 }
  0x1b   :  { %147 = vmatpush1.bf16.msra.mxu0 %v756_v21 }
  0x1c   :  { %148 = vmatprep.subr.bf16.mxu0 %v757_v23 }
  0x1f   :  { %149 = vmatpush1.bf16.msra.mxu0 %v759_v25 }
  0x20   :  { %13 = vsyncpa [#allocation4], 0  ;;  %v771_v28 = vld [vmem:[%s1020_s2 + $0x50] sm:$0xff]   ;;  %v773_v30 = vld [vmem:[%s1020_s2 + $0x48] sm:$0xff]   ;;  %v812_v35 = vmov 0.0   ;;  %vm813_vm0 = vmmov 0   ;;  %v545_v18 = vstv %s1024_s6 }
  0x21   :  { %v772_v29 = vld [vmem:[%s1020_s2 + $0x10] sm:$0xff]   ;;  %666 = vmatprep.subr.bf16.mxu1 %v771_v28  ;;  %v774_v31 = vld [vmem:[%s1020_s2 + $0x8] sm:$0xff]   ;;  %v775_v32 = vld [vmem:[%s1020_s2 + $0x40] sm:$0xff]   ;;  %694 = vmatprep.subr.bf16.mxu0 %v812_v35  ;;  %vm495_vm1 = vcmask 523264   ;;  %vm546_vm2 = vcmask 261120   ;;  %s814_s19 = smov [#allocation3]  }
  0x22   :  { %167 = vmatmul.mubr.bf16.vlgmr.msra.gmra.mxu0 %v760_v27  ;;  %667 = vmatpush3.bf16.msra.mxu1 %v772_v29  ;;  %v776_v33 = vld [vmem:[%s1020_s2] sm:$0xff]   ;;  %v777_v34 = vld [vmem:[%s1021_s3 + $0x38] sm:$0xff]   ;;  %v778_v36 = vld [vmem:[%s1021_s3 + $0x30] sm:$0xff]   ;;  %s601_s20 = sshll.u32 %s814_s19, 4  ;;  %vm593_vm3 = vcmask 122880   ;;  %s602_s20 = int_to_ptr.vmem [resolvable:$true] %s601_s20 }
  0x23   :  { %668 = vmatprep.subr.bf16.mxu1 %v773_v30  ;;  %695 = vmatpush3.bf16.msra.mxu0 %v777_v34  ;;  %v779_v37 = vld [vmem:[%s1021_s3 + $0x28] sm:$0xff]   ;;  %v780_v38 = vld [vmem:[%s1021_s3 + $0x20] sm:$0xff]   ;;  %v781_v49 = vld [vmem:[%s1021_s3 + $0x18] sm:$0xff]   ;;  %s789_s21 = scalar_lea.vmem %s602_s20, 16  ;;  %s793_s22 = scalar_lea.vmem %s602_s20, 32 }
  0x24   :  { %696 = vmatprep.subr.bf16.mxu0 %v812_v35  ;;  %v782_v50 = vld [vmem:[%s1021_s3 + $0x10] sm:$0xff]   ;;  %v783_v51 = vld [vmem:[%s1021_s3 + $0x8] sm:$0xff]   ;;  %v784_v52 = vld [vmem:[%s1021_s3] sm:$0xff]   ;;  %710 = vmatprep.mubr.msk.bf16.mxu0 %vm813_vm0, %v812_v35  ;;  %p790_p0 = scmp.ne.s32.totalorder %s602_s20, %s789_s21  ;;  %p794_p1 = scmp.lt.s32.totalorder %s602_s20, %s602_s20 }
  0x25   :  { %v785_v53 = vld [vmem:[%s1022_s4 + $0x18] sm:$0xff]   ;;  %v786_v63 = vld [vmem:[%s1022_s4 + $0x10] sm:$0xff]   ;;  %v787_v0 = vld [vmem:[%s1022_s4 + $0x8] sm:$0xff]   ;;  %p795_p2 = scmp.lt.s32.totalorder %s793_s22, %s789_s21 }
  0x26   :  { %669 = vmatpush3.bf16.msra.mxu1 %v774_v31  ;;  %v788_v1 = vld [vmem:[%s1022_s4] sm:$0xff]  }
  0x27   :  { %670 = vmatprep.subr.bf16.mxu1 %v775_v32  ;;  %697 = vmatpush3.bf16.msra.mxu0 %v778_v36  ;;  %v543_v17 = vld [vmem:[%s1023_s5] sm:$0x1]  ;;  %p796_p3 = por %p795_p2, %p794_p1 }
  0x28   :  { %698 = vmatprep.subr.bf16.mxu0 %v812_v35 }
  0x29   :  { %p797_p4 = pnand %p796_p3, %p790_p0 }
  0x2a   :  { %671 = vmatpush3.bf16.msra.mxu1 %v776_v33 }
  0x2b   :  { %714 = vmatprep.subr.bf16.mxu1 %v812_v35  ;;  %699 = vmatpush3.bf16.msra.mxu0 %v779_v37 }
  0x2c   :  { %700 = vmatprep.subr.bf16.mxu0 %v812_v35 }
  0x2f   :  { %701 = vmatpush3.bf16.msra.mxu0 %v780_v38 }
  0x30   :  { %702 = vmatprep.subr.bf16.mxu0 %v812_v35 }
  0x33   :  { %703 = vmatpush3.bf16.msra.mxu0 %v781_v49 }
  0x34   :  { %704 = vmatprep.subr.bf16.mxu0 %v812_v35 }
  0x37   :  { %705 = vmatpush3.bf16.msra.mxu0 %v782_v50 }
  0x38   :  { %706 = vmatprep.subr.bf16.mxu0 %v812_v35 }
  0x3b   :  { %707 = vmatpush3.bf16.msra.mxu0 %v783_v51 }
  0x3c   :  { %708 = vmatprep.subr.bf16.mxu0 %v812_v35 }
  0x3f   :  { %709 = vmatpush3.bf16.msra.mxu0 %v784_v52 }
  0xe2   :  { %v168_v39 = vpop.f32.mrf.mxu0 }
  0xe4   :  { %v170_v40 = vpop.f32.mrf.mxu0 }
  0xe6   :  { %v172_v41 = vpop.f32.mrf.mxu0 }
  0xe7   :  { %v177_v42 = vpack.c.bf16 %v172_v41, %v168_v39 }
  0xe8   :  { %v174_v43 = vpop.f32.mrf.mxu0 }
  0xe9   :  { %v178_v44 = vpack.c.bf16 %v174_v43, %v170_v40  ;;  %v179_v45 = vmul.bf16 1009007652, %v177_v42 }
  0xeb   :  { %v180_v46 = vmul.bf16 1009007652, %v178_v44  ;;  %v181_v48 = vmax.bf16 %v179_v45, %v177_v42 }
  0xed   :  { %v182_v47 = vmax.bf16 %v180_v46, %v178_v44 }
  0xef   :  { %343 = vmatprep.mubr.bf16.mxu1 %v182_v47 }
  0xf0   :  { %344 = vmatmul.mubr.bf16.vlgmr.msra.gmra.mxu1 %v181_v48 }
  0xf1   :  { %722 = vmatprep.mubr.msk.bf16.mxu1 %vm813_vm0, %v812_v35  ;;  %715 = vmatpush3.bf16.msra.mxu1 %v785_v53 }
  0xf2   :  { %716 = vmatprep.subr.bf16.mxu1 %v812_v35 }
  0xf5   :  { %717 = vmatpush3.bf16.msra.mxu1 %v786_v63 }
  0xf6   :  { %718 = vmatprep.subr.bf16.mxu1 %v812_v35 }
  0xf9   :  { %719 = vmatpush3.bf16.msra.mxu1 %v787_v0 }
  0xfa   :  { %720 = vmatprep.subr.bf16.mxu1 %v812_v35 }
  0xfd   :  { %721 = vmatpush3.bf16.msra.mxu1 %v788_v1 }
  0xfe   :  { %726 = vmatprep.subr.bf16.mxu1 %v812_v35 }
 0x1b0   :  { %v672_v54 = vpop.f32.mrf.mxu1 }
 0x1b2   :  { %v673_v55 = vpop.f32.mrf.mxu1 }
 0x1b3   :  { %v674_v58 = vadd.f32 %v673_v55, %v672_v54 }
 0x1b4   :  { %v675_v56 = vpop.f32.mrf.mxu1 }
 0x1b6   :  { %v676_v57 = vpop.f32.mrf.mxu1 }
 0x1b7   :  { %v677_v59 = vadd.f32 %v676_v57, %v675_v56 }
 0x1b9   :  { %v352_v60 = vpack.c.bf16 %v677_v59, %v674_v58 }
 0x1bb   :  { %v353_v61 = vmul.bf16 1009007652, %v352_v60 }
 0x1bd   :  { %v354_v62 = vmax.bf16 %v353_v61, %v352_v60 }
 0x1bf   :  { %711 = vmatmul.mubr.bf16.vlgmr.msra.gmra.mxu0 %v354_v62 }
 0x27f   :  { %v453_v2 = vpop.f32.mrf.mxu0 }
 0x281   :  { %v712_v3 = vpop.f32.mrf.mxu0 }
 0x283   :  { %v456_v4 = vpop.f32.mrf.mxu0 }
 0x284   :  { %v460_v5 = vpack.c.bf16 %v456_v4, %v453_v2 }
 0x285   :  { %v713_v6 = vpop.f32.mrf.mxu0 }
 0x286   :  { %v461_v7 = vmul.bf16 1009007652, %v460_v5 }
 0x288   :  { %v462_v8 = vmax.bf16 %v461_v7, %v460_v5 }
 0x28a   :  { %723 = vmatmul.mubr.msk.bf16.vlgmr.msra.gmra.mxu1 %vm495_vm1, %v462_v8 }
 0x28b   :  { %728 = vmatprep.mubr.msk.bf16.mxu1 %vm813_vm0, %v812_v35 }
 0x34a   :  { %v533_v9 = vpop.f32.mrf.mxu1 }
 0x34c   :  { %v724_v10 = vpop.f32.mrf.mxu1 }
 0x34e   :  { %v536_v11 = vpop.f32.mrf.mxu1 }
 0x34f   :  { %v540_v12 = vpack.c.bf16 %v536_v11, %v533_v9 }
 0x350   :  { %v725_v13 = vpop.f32.mrf.mxu1 }
 0x351   :  { %v541_v14 = vmul.bf16 1009007652, %v540_v12 }
 0x353   :  { %v542_v15 = vmax.bf16 %v541_v14, %v540_v12 }
 0x355   :  { %v551_v16 = vsel %vm546_vm2, %v542_v15, 0 }
 0x356   :  { %727 = vmatpush3.bf16.xpose.msra.mxu1 %v551_v16 }
 0x35d   :  { %729 = vmatmul.mubr.msk.bf16.vlgmr.msra.gmra.mxu1 %vm546_vm2, %v543_v17 }
 0x41d   :  { %v587_v19 = vpop.f32.mrf.mxu1 }
 0x41e   :  { %v588_v20 = vadd.f32 %v587_v19, %v545_v18 }
 0x41f   :  { %v730_v21 = vpop.f32.mrf.mxu1 }
 0x420   :  { %594 = vst.msk [vmem:[#allocation3] sm:$0x1] %vm593_vm3, %v588_v20 }
 0x421   :  { %v590_v22 = vpop.f32.mrf.mxu1 }
 0x422   :  { %800 = shalt.err (!%p797_p4)
}
 0x423   :  { %604 = dma.vmem_to_hbm [thread:$0]  %s602_s20, 16, %s1025_s7, [#allocation4]   ;;  %v731_v23 = vpop.f32.mrf.mxu1 }
 0x424   :  { %809 = dma.done.wait [#allocation4], 16  }
 0x425   :  { %810 = vsyncadd [#allocation4], 4294967280 }
 0x426   :  { %608 = vsyncpa [#allocation4], 1 }

// kernel: _forward_core.3
= control target key start
LH: loop header
LB: loop body
LE: loop exit
PB: predicated region body
PF: predicated region fallthrough
CT: control target
= control target key end

     0   :  { %vm495_vm0 = vcmask 523264   ;;  %vm828_vm1 = vmmov 0   ;;  %vm559_vm2 = vcmask 261120   ;;  %vm603_vm3 = vcmask 122880   ;;  %s997_s0 = inlined_call_operand.vmem [shape: bf16[256,16], index: 0, kind: input, shape index: {}]   ;;  %s998_s1 = inlined_call_operand.vmem [shape: bf16[128,256], index: 1, kind: input, shape index: {}]   ;;  %s999_s2 = inlined_call_operand.vmem [shape: bf16[64,128], index: 2, kind: input, shape index: {}]   ;;  %s1000_s3 = inlined_call_operand.vmem [shape: bf16[32,64], index: 3, kind: input, shape index: {}]   ;;  %s1001_s4 = inlined_call_operand.vmem [shape: bf16[1,32], index: 4, kind: input, shape index: {}]   ;;  %s1002_s5 = inlined_call_operand.<no memory space> [shape: f32[1,1], index: 5, kind: input, shape index: {}]   ;;  %s1003_s6 = inlined_call_operand.vmem [shape: f32[1,16], index: 6, kind: output, shape index: {}]  }
   0x1   :  { %v781_v0 = vld [vmem:[%s997_s0 + $0x78] sm:$0xff]   ;;  %v783_v2 = vld [vmem:[%s997_s0 + $0x70] sm:$0xff]   ;;  %v785_v4 = vld [vmem:[%s997_s0 + $0x68] sm:$0xff]  }
   0x2   :  { %v782_v1 = vld [vmem:[%s997_s0 + $0x38] sm:$0xff]   ;;  %650 = vmatprep.subr.bf16.mxu0 %v781_v0  ;;  %v784_v3 = vld [vmem:[%s997_s0 + $0x30] sm:$0xff]   ;;  %v786_v5 = vld [vmem:[%s997_s0 + $0x28] sm:$0xff]  }
   0x3   :  { %651 = vmatpush3.bf16.msra.mxu0 %v782_v1  ;;  %v787_v6 = vld [vmem:[%s997_s0 + $0x60] sm:$0xff]   ;;  %v789_v8 = vld [vmem:[%s997_s0 + $0x58] sm:$0xff]   ;;  %v791_v10 = vld [vmem:[%s997_s0 + $0x50] sm:$0xff]  }
   0x4   :  { %652 = vmatprep.subr.bf16.mxu0 %v783_v2  ;;  %v788_v7 = vld [vmem:[%s997_s0 + $0x20] sm:$0xff]   ;;  %v790_v9 = vld [vmem:[%s997_s0 + $0x18] sm:$0xff]   ;;  %v792_v12 = vld [vmem:[%s997_s0 + $0x10] sm:$0xff]  }
   0x5   :  { %v799_v11 = vld [vmem:[%s998_s1 + $0x4] ss:$8 sps:$4 sm:$0xff]   ;;  %v797_v17 = vld [vmem:[%s998_s1] ss:$8 sps:$4 sm:$0xff]   ;;  %v800_v18 = vld [vmem:[%s998_s1 + $0x14] ss:$8 sps:$4 sm:$0xff]  }
   0x6   :  { %283 = vmatprep.mubr.bf16.mxu0 %v799_v11  ;;  %v793_v13 = vld [vmem:[%s997_s0 + $0x48] sm:$0xff]   ;;  %v795_v15 = vld [vmem:[%s997_s0 + $0x40] sm:$0xff]   ;;  %v802_v19 = vld [vmem:[%s998_s1 + $0x10] ss:$8 sps:$4 sm:$0xff]  }
   0x7   :  { %653 = vmatpush3.bf16.msra.mxu0 %v784_v3  ;;  %v794_v14 = vld [vmem:[%s997_s0 + $0x8] sm:$0xff]   ;;  %v796_v16 = vld [vmem:[%s997_s0] sm:$0xff]   ;;  %v806_v22 = vld [vmem:[%s998_s1 + $0x34] ss:$8 sps:$4 sm:$0xff]  }
   0x8   :  { %654 = vmatprep.subr.bf16.mxu0 %v785_v4  ;;  %v803_v20 = vld [vmem:[%s998_s1 + $0x24] ss:$8 sps:$4 sm:$0xff]   ;;  %v805_v21 = vld [vmem:[%s998_s1 + $0x20] ss:$8 sps:$4 sm:$0xff]   ;;  %v808_v23 = vld [vmem:[%s998_s1 + $0x30] ss:$8 sps:$4 sm:$0xff]  }
   0x9   :  { %v809_v24 = vld [vmem:[%s998_s1 + $0x44] ss:$8 sps:$4 sm:$0xff]   ;;  %v811_v25 = vld [vmem:[%s998_s1 + $0x40] ss:$8 sps:$4 sm:$0xff]   ;;  %v812_v26 = vld [vmem:[%s998_s1 + $0x54] ss:$8 sps:$4 sm:$0xff]  }
   0xa   :  { %v814_v27 = vld [vmem:[%s998_s1 + $0x50] ss:$8 sps:$4 sm:$0xff]   ;;  %v815_v28 = vld [vmem:[%s998_s1 + $0x64] ss:$8 sps:$4 sm:$0xff]   ;;  %v817_v29 = vld [vmem:[%s998_s1 + $0x60] ss:$8 sps:$4 sm:$0xff]  }
   0xb   :  { %655 = vmatpush3.bf16.msra.mxu0 %v786_v5  ;;  %v818_v30 = vld [vmem:[%s998_s1 + $0x74] ss:$8 sps:$4 sm:$0xff]   ;;  %v820_v31 = vld [vmem:[%s998_s1 + $0x70] ss:$8 sps:$4 sm:$0xff]   ;;  %v821_v32 = vld [vmem:[%s999_s2] sm:$0xff]  }
   0xc   :  { %656 = vmatprep.subr.bf16.mxu0 %v787_v6  ;;  %751 = vmatprep.mubr.bf16.mxu1 %v821_v32 }
   0xf   :  { %657 = vmatpush3.bf16.msra.mxu0 %v788_v7 }
  0x10   :  { %658 = vmatprep.subr.bf16.mxu0 %v789_v8 }
  0x13   :  { %659 = vmatpush3.bf16.msra.mxu0 %v790_v9 }
  0x14   :  { %660 = vmatprep.subr.bf16.mxu0 %v791_v10 }
  0x17   :  { %661 = vmatpush3.bf16.msra.mxu0 %v792_v12 }
  0x18   :  { %662 = vmatprep.subr.bf16.mxu0 %v793_v13 }
  0x1b   :  { %663 = vmatpush3.bf16.msra.mxu0 %v794_v14 }
  0x1c   :  { %664 = vmatprep.subr.bf16.mxu0 %v795_v15 }
  0x1f   :  { %665 = vmatpush3.bf16.msra.mxu0 %v796_v16 }
  0x22   :  { %284 = vmatmul.mubr.bf16.vlgmr.msra.gmra.mxu0 %v797_v17 }
  0x23   :  { %291 = vmatprep.mubr.bf16.mxu0 %v800_v18 }
  0x2a   :  { %292 = vmatmul.mubr.bf16.gmra.mxu0 %v802_v19 }
  0x2b   :  { %299 = vmatprep.mubr.bf16.mxu0 %v803_v20 }
  0x32   :  { %300 = vmatmul.mubr.bf16.gmra.mxu0 %v805_v21 }
  0x33   :  { %307 = vmatprep.mubr.bf16.mxu0 %v806_v22 }
  0x3a   :  { %308 = vmatmul.mubr.bf16.gmra.mxu0 %v808_v23 }
  0x3b   :  { %315 = vmatprep.mubr.bf16.mxu0 %v809_v24 }
  0x42   :  { %316 = vmatmul.mubr.bf16.gmra.mxu0 %v811_v25 }
  0x43   :  { %323 = vmatprep.mubr.bf16.mxu0 %v812_v26 }
  0x4a   :  { %324 = vmatmul.mubr.bf16.gmra.mxu0 %v814_v27 }
  0x4b   :  { %331 = vmatprep.mubr.bf16.mxu0 %v815_v28 }
  0x52   :  { %332 = vmatmul.mubr.bf16.gmra.mxu0 %v817_v29 }
  0x53   :  { %339 = vmatprep.mubr.bf16.mxu0 %v818_v30 }
  0x5a   :  { %340 = vmatmul.mubr.bf16.gmra.mxu0 %v820_v31 }
  0xe2   :  { %v666_v33 = vpop.f32.mrf.mxu0 }
  0xe4   :  { %v667_v34 = vpop.f32.mrf.mxu0 }
  0xe5   :  { %v668_v35 = vadd.f32 %v667_v34, %v666_v33 }
  0xe6   :  { %v669_v36 = vpop.f32.mrf.mxu0 }
  0xe8   :  { %v670_v37 = vpop.f32.mrf.mxu0 }
  0xe9   :  { %v671_v38 = vadd.f32 %v670_v37, %v669_v36 }
  0xea   :  { %v672_v39 = vpop.f32.mrf.mxu0 }
  0xeb   :  { %v963_v40 = vpack.c.bf16 %v671_v38, %v668_v35 }
  0xec   :  { %v673_v41 = vpop.f32.mrf.mxu0 }
  0xed   :  { %v674_v42 = vadd.f32 %v673_v41, %v672_v39  ;;  %v356_v38 = vmul.bf16 1009007652, %v963_v40 }
  0xee   :  { %v675_v43 = vpop.f32.mrf.mxu0 }
  0xef   :  { %v364_v41 = vmax.bf16 %v356_v38, %v963_v40  ;;  %v825_v40 = vld [vmem:[%s1000_s3] sm:$0xff]  }
  0xf0   :  { %v676_v44 = vpop.f32.mrf.mxu0 }
  0xf1   :  { %v677_v45 = vadd.f32 %v676_v44, %v675_v43  ;;  %v823_v43 = vld [vmem:[%s999_s2 + $0x10] sm:$0xff]   ;;  %v824_v44 = vld [vmem:[%s999_s2 + $0x18] sm:$0xff]  }
  0xf2   :  { %v678_v46 = vpop.f32.mrf.mxu0 }
  0xf3   :  { %v965_v47 = vpack.c.bf16 %v677_v45, %v674_v42  ;;  %v822_v42 = vld [vmem:[%s999_s2 + $0x8] sm:$0xff]  }
  0xf4   :  { %v679_v48 = vpop.f32.mrf.mxu0 }
  0xf5   :  { %v680_v30 = vadd.f32 %v679_v48, %v678_v46  ;;  %v357_v36 = vmul.bf16 1009007652, %v965_v47 }
  0xf6   :  { %v681_v49 = vpop.f32.mrf.mxu0 }
  0xf7   :  { %v365_v39 = vmax.bf16 %v357_v36, %v965_v47 }
  0xf8   :  { %v682_v50 = vpop.f32.mrf.mxu0 }
  0xf9   :  { %v683_v26 = vadd.f32 %v682_v50, %v681_v49 }
  0xfa   :  { %v684_v51 = vpop.f32.mrf.mxu0 }
  0xfb   :  { %v350_v31 = vpack.c.bf16 %v683_v26, %v680_v30 }
  0xfc   :  { %v685_v52 = vpop.f32.mrf.mxu0 }
  0xfd   :  { %v686_v25 = vadd.f32 %v685_v52, %v684_v51  ;;  %v358_v34 = vmul.bf16 1009007652, %v350_v31 }
  0xfe   :  { %v687_v53 = vpop.f32.mrf.mxu0 }
  0xff   :  { %v366_v37 = vmax.bf16 %v358_v34, %v350_v31 }
 0x100   :  { %v688_v54 = vpop.f32.mrf.mxu0 }
 0x101   :  { %v689_v21 = vadd.f32 %v688_v54, %v687_v53 }
 0x102   :  { %v690_v55 = vpop.f32.mrf.mxu0 }
 0x103   :  { %v351_v27 = vpack.c.bf16 %v689_v21, %v686_v25 }
 0x104   :  { %v691_v56 = vpop.f32.mrf.mxu0 }
 0x105   :  { %v692_v19 = vadd.f32 %v691_v56, %v690_v55  ;;  %v359_v32 = vmul.bf16 1009007652, %v351_v27 }
 0x106   :  { %v693_v57 = vpop.f32.mrf.mxu0 }
 0x107   :  { %v367_v35 = vmax.bf16 %v359_v32, %v351_v27 }
 0x108   :  { %v694_v58 = vpop.f32.mrf.mxu0 }
 0x109   :  { %v695_v15 = vadd.f32 %v694_v58, %v693_v57 }
 0x10a   :  { %v696_v59 = vpop.f32.mrf.mxu0 }
 0x10b   :  { %v352_v22 = vpack.c.bf16 %v695_v15, %v692_v19 }
 0x10c   :  { %v697_v60 = vpop.f32.mrf.mxu0 }
 0x10d   :  { %v698_v13 = vadd.f32 %v697_v60, %v696_v59  ;;  %v360_v28 = vmul.bf16 1009007652, %v352_v22 }
 0x10e   :  { %v699_v61 = vpop.f32.mrf.mxu0 }
 0x10f   :  { %v368_v33 = vmax.bf16 %v360_v28, %v352_v22 }
 0x110   :  { %v700_v62 = vpop.f32.mrf.mxu0 }
 0x111   :  { %v701_v9 = vadd.f32 %v700_v62, %v699_v61 }
 0x112   :  { %v702_v63 = vpop.f32.mrf.mxu0 }
 0x113   :  { %v353_v16 = vpack.c.bf16 %v701_v9, %v698_v13  ;;  %v557_v13 = vld [vmem:[%s1001_s4] sm:$0x1] }
 0x114   :  { %v703_v0 = vpop.f32.mrf.mxu0 }
 0x115   :  { %v704_v7 = vadd.f32 %v703_v0, %v702_v63  ;;  %v361_v23 = vmul.bf16 1009007652, %v353_v16 }
 0x116   :  { %v705_v1 = vpop.f32.mrf.mxu0 }
 0x117   :  { %v369_v29 = vmax.bf16 %v361_v23, %v353_v16 }
 0x118   :  { %v706_v2 = vpop.f32.mrf.mxu0 }
 0x119   :  { %v707_v5 = vadd.f32 %v706_v2, %v705_v1  ;;  %v826_v1 = vld [vmem:[%s1000_s3 + $0x8] sm:$0xff]   ;;  %v827_v2 = vmov 0.0  }
 0x11a   :  { %v708_v3 = vpop.f32.mrf.mxu0 }
 0x11b   :  { %v354_v10 = vpack.c.bf16 %v707_v5, %v704_v7 }
 0x11c   :  { %v709_v4 = vpop.f32.mrf.mxu0 }
 0x11d   :  { %v710_v11 = vadd.f32 %v709_v4, %v708_v3  ;;  %v362_v17 = vmul.bf16 1009007652, %v354_v10 }
 0x11e   :  { %v711_v6 = vpop.f32.mrf.mxu0 }
 0x11f   :  { %v370_v24 = vmax.bf16 %v362_v17, %v354_v10 }
 0x120   :  { %v712_v8 = vpop.f32.mrf.mxu0 }
 0x121   :  { %v713_v12 = vadd.f32 %v712_v8, %v711_v6 }
 0x123   :  { %v355_v14 = vpack.c.bf16 %v713_v12, %v710_v11 }
 0x125   :  { %v363_v18 = vmul.bf16 1009007652, %v355_v14 }
 0x127   :  { %v371_v20 = vmax.bf16 %v363_v18, %v355_v14  ;;  %v558_v14 = vstv %s1002_s5 }
 0x129   :  { %735 = vmatprep.subr.bf16.mxu1 %v371_v20 }
 0x12a   :  { %736 = vmatpush3.bf16.msra.mxu1 %v371_v20 }
 0x12b   :  { %737 = vmatprep.subr.bf16.mxu1 %v370_v24 }
 0x12e   :  { %738 = vmatpush3.bf16.msra.mxu1 %v370_v24 }
 0x12f   :  { %739 = vmatprep.subr.bf16.mxu1 %v369_v29 }
 0x132   :  { %740 = vmatpush3.bf16.msra.mxu1 %v369_v29 }
 0x133   :  { %741 = vmatprep.subr.bf16.mxu1 %v368_v33 }
 0x136   :  { %742 = vmatpush3.bf16.msra.mxu1 %v368_v33 }
 0x137   :  { %743 = vmatprep.subr.bf16.mxu1 %v367_v35 }
 0x13a   :  { %744 = vmatpush3.bf16.msra.mxu1 %v367_v35 }
 0x13b   :  { %745 = vmatprep.subr.bf16.mxu1 %v366_v37 }
 0x13e   :  { %746 = vmatpush3.bf16.msra.mxu1 %v366_v37 }
 0x13f   :  { %747 = vmatprep.subr.bf16.mxu1 %v365_v39 }
 0x142   :  { %748 = vmatpush3.bf16.msra.mxu1 %v365_v39 }
 0x143   :  { %749 = vmatprep.subr.bf16.mxu1 %v364_v41 }
 0x146   :  { %750 = vmatpush3.bf16.msra.mxu1 %v364_v41 }
 0x149   :  { %752 = vmatmul.mubr.bf16.vlgmr.msra.gmra.mxu1 %v822_v42 }
 0x14a   :  { %755 = vmatprep.mubr.bf16.mxu1 %v823_v43 }
 0x151   :  { %756 = vmatmul.mubr.bf16.gmra.mxu1 %v824_v44 }
 0x152   :  { %767 = vmatprep.mubr.msk.bf16.mxu1 %vm495_vm0, %v825_v40 }
 0x209   :  { %v753_v45 = vpop.f32.mrf.mxu1 }
 0x20b   :  { %v438_v46 = vpop.f32.mrf.mxu1 }
 0x20d   :  { %v754_v47 = vpop.f32.mrf.mxu1 }
 0x20e   :  { %v470_v54 = vpack.c.bf16 %v754_v47, %v753_v45 }
 0x20f   :  { %v441_v48 = vpop.f32.mrf.mxu1 }
 0x210   :  { %v474_v59 = vmul.bf16 1009007652, %v470_v54  ;;  %v469_v60 = vpack.c.bf16 %v441_v48, %v438_v46 }
 0x211   :  { %v757_v49 = vpop.f32.mrf.mxu1 }
 0x212   :  { %v478_v62 = vmax.bf16 %v474_v59, %v470_v54  ;;  %v473_v63 = vmul.bf16 1009007652, %v469_v60 }
 0x213   :  { %v454_v50 = vpop.f32.mrf.mxu1 }
 0x214   :  { %v477_v0 = vmax.bf16 %v473_v63, %v469_v60 }
 0x215   :  { %v758_v51 = vpop.f32.mrf.mxu1 }
 0x216   :  { %v472_v52 = vpack.c.bf16 %v758_v51, %v757_v49 }
 0x217   :  { %v457_v53 = vpop.f32.mrf.mxu1 }
 0x218   :  { %v476_v55 = vmul.bf16 1009007652, %v472_v52  ;;  %v471_v56 = vpack.c.bf16 %v457_v53, %v454_v50 }
 0x21a   :  { %v480_v57 = vmax.bf16 %v476_v55, %v472_v52  ;;  %v475_v58 = vmul.bf16 1009007652, %v471_v56 }
 0x21c   :  { %v479_v61 = vmax.bf16 %v475_v58, %v471_v56  ;;  %759 = vmatprep.subr.bf16.mxu1 %v480_v57 }
 0x21d   :  { %760 = vmatpush3.bf16.msra.mxu1 %v480_v57 }
 0x21e   :  { %761 = vmatprep.subr.bf16.mxu1 %v479_v61 }
 0x221   :  { %762 = vmatpush3.bf16.msra.mxu1 %v479_v61 }
 0x222   :  { %763 = vmatprep.subr.bf16.mxu1 %v478_v62 }
 0x225   :  { %764 = vmatpush3.bf16.msra.mxu1 %v478_v62 }
 0x226   :  { %765 = vmatprep.subr.bf16.mxu1 %v477_v0 }
 0x229   :  { %766 = vmatpush3.bf16.msra.mxu1 %v477_v0 }
 0x22a   :  { %771 = vmatprep.subr.bf16.mxu1 %v827_v2 }
 0x22c   :  { %768 = vmatmul.mubr.msk.bf16.vlgmr.msra.gmra.mxu1 %vm495_vm0, %v826_v1 }
 0x22d   :  { %775 = vmatprep.mubr.msk.bf16.mxu1 %vm828_vm1, %v827_v2 }
 0x2ec   :  { %v769_v3 = vpop.f32.mrf.mxu1 }
 0x2ee   :  { %v536_v4 = vpop.f32.mrf.mxu1 }
 0x2f0   :  { %v770_v5 = vpop.f32.mrf.mxu1 }
 0x2f1   :  { %v552_v6 = vpack.c.bf16 %v770_v5, %v769_v3 }
 0x2f2   :  { %v539_v7 = vpop.f32.mrf.mxu1 }
 0x2f3   :  { %v554_v8 = vmul.bf16 1009007652, %v552_v6  ;;  %v551_v9 = vpack.c.bf16 %v539_v7, %v536_v4 }
 0x2f5   :  { %v556_v10 = vmax.bf16 %v554_v8, %v552_v6  ;;  %v553_v11 = vmul.bf16 1009007652, %v551_v9 }
 0x2f7   :  { %772 = vmatpush3.bf16.msra.mxu1 %v556_v10  ;;  %v555_v12 = vmax.bf16 %v553_v11, %v551_v9 }
 0x2f8   :  { %773 = vmatprep.subr.bf16.mxu1 %v827_v2 }
 0x2fb   :  { %774 = vmatpush3.bf16.msra.mxu1 %v555_v12 }
 0x2fe   :  { %776 = vmatmul.mubr.msk.bf16.vlgmr.msra.gmra.mxu1 %vm559_vm2, %v557_v13 }
 0x3be   :  { %v597_v15 = vpop.f32.mrf.mxu1 }
 0x3bf   :  { %v598_v16 = vadd.f32 %v597_v15, %v558_v14 }
 0x3c0   :  { %v777_v17 = vpop.f32.mrf.mxu1 }
 0x3c1   :  { %604 = vst.msk [vmem:[%s1003_s6] sm:$0x1] %vm603_vm3, %v598_v16 }
 0x3c2   :  { %v600_v18 = vpop.f32.mrf.mxu1 }
 0x3c4   :  { %v778_v19 = vpop.f32.mrf.mxu1 }

</bundles_post_ra>
